<compile_context>
chip_gen: v5e
topology: v5e:2x2
jax: 0.10.0
libtpu: 0.0.40
codegen_flags: <defaults>
</compile_context>

<pallas_src>
import jax
import jax.numpy as jnp
from jax.experimental import pallas as pl
from jax.experimental.pallas import tpu as pltpu

DROPOUT_PROB = 0.1
HIDDEN_DIM = 300
HIDDEN_PAD = 384          # 3 * 128 lanes (zero-padded hidden)
INPUT_DIM = 28 * 28       # 784
Z_DIM = 2
OUT_ROWS = 8              # mean(2) | logvar(2) | z(2) | pad(2)  -> aligned sublanes


def _cdiv(a, b):
    return (a + b - 1) // b


def _encoder_kernel(x_ref, w1_ref, b1_ref, wml_ref, bml_ref, eps_ref, out_ref):
    # fc1: cast x to bf16 in-register (no wrapper-side HBM cast pass);
    # bf16 x bf16 -> f32 accumulation on the MXU.
    x_bf = x_ref[...].astype(jnp.bfloat16)
    pre = jnp.dot(x_bf, w1_ref[...], preferred_element_type=jnp.float32) + b1_ref[...]
    # bf16 tanh (bf16 EUP path on v6e/v7x) also halves h's vreg/VMEM footprint.
    h = jnp.tanh(pre.astype(jnp.bfloat16))
    # TODO(synk): train-mode nn.Dropout masking would need pltpu.prng_seed +
    # pltpu.stateful_bernoulli; eval-mode dropout is the identity used here.

    # Fused mean/logvar projection in the natural [TB, H] @ [H, 8] orientation
    # (bf16 x bf16 -> f32): no transpose of the large h activation is needed.
    ml_t = (jnp.dot(h, wml_ref[...], preferred_element_type=jnp.float32)
            + bml_ref[...])                              # [TB, 8]

    # Transpose only the small result (XLU) so the packed output block stays
    # lane-dense [8, TB] (unmasked stores): rows = mean(2)|logvar(2)|z(2)|pad.
    ml = ml_t.T                                          # [8, TB]
    mean = ml[0:Z_DIM, :]
    logvar = ml[Z_DIM:2 * Z_DIM, :]
    eps_t = eps_ref[...].T                               # [2, TB] (tiny XLU transpose)
    z = mean + jnp.exp(0.5 * logvar) * eps_t

    # Direct row-slice stores (no concat temporary).  Rows 6:8 of the packed
    # block are never read by the wrapper and are left unwritten.
    out_ref[0:2 * Z_DIM, :] = ml[0:2 * Z_DIM, :]
    out_ref[2 * Z_DIM:3 * Z_DIM, :] = z


def pack_params(params):
    """Pad/fuse raw f32 params into the kernel-resident layout (do this ONCE).

    Hidden columns 300:384 are zero in W1, b1 and the fused Wm|Wl, so the
    padded hidden features are exactly tanh(0) = 0 and never contaminate the
    outputs (invariant must be kept if this packing is ever changed).
    """
    w1 = jnp.zeros((INPUT_DIM, HIDDEN_PAD), jnp.float32)
    w1 = w1.at[:, :HIDDEN_DIM].set(params["w1_t"]).astype(jnp.bfloat16)

    b1 = jnp.zeros((1, HIDDEN_PAD), jnp.float32)
    b1 = b1.at[:, :HIDDEN_DIM].set(params["b1"])

    # Fused, pre-transposed mean|logvar weight: [HIDDEN_PAD, 8] bf16,
    # columns = mean(2) | logvar(2) | zero-pad(4).
    wml = jnp.zeros((HIDDEN_PAD, OUT_ROWS), jnp.float32)
    wml = wml.at[:HIDDEN_DIM, 0:Z_DIM].set(params["wm_t"])
    wml = wml.at[:HIDDEN_DIM, Z_DIM:2 * Z_DIM].set(params["wl_t"])
    wml = wml.astype(jnp.bfloat16)

    bml = jnp.zeros((1, OUT_ROWS), jnp.float32)
    bml = bml.at[0, 0:Z_DIM].set(params["bm"].reshape(-1))
    bml = bml.at[0, Z_DIM:2 * Z_DIM].set(params["bl"].reshape(-1))

    return dict(w1=w1, b1=b1, wml=wml, bml=bml)


def _choose_tiling(B, max_tb):
    """Pick (tile_rows, num_tiles) for the batch axis.

    Preference order: several exactly-dividing tiles (megacore sharding +
    double-buffered DMA) > one exact full-array block > full tiles plus a
    partial tail block (only for large non-128-aligned batches; Pallas masks
    the out-of-bounds tail of the last block).
    """
    if B % 128 == 0 and B > 128:
        target = max(4, _cdiv(B, max_tb))                     # >=4 tiles when possible
        tb = min(max_tb, max(128, (B // target) // 128 * 128))
        while B % tb != 0:                                    # 128 always divides B here
            tb -= 128
        return tb, B // tb
    if B <= max_tb:
        return B, 1                                           # one exact full-array block
    return max_tb, _cdiv(B, max_tb)                           # partial tail block


def gaussian_encoder_forward(x, packed, eps, *, max_tb=2048):
    """x: [B, 784] f32, eps: [B, 2] f32 -> (z, mean, logvar), each [B, 2] f32.

    `packed` comes from pack_params(); pack once and reuse across calls.
    max_tb: batch rows per tile.  2048 is safe on all generations; v6e
    (HBM-bound, 128 MiB VMEM) can be pushed to 4096; keep <= 4096 on v7x
    (64 MiB physical VMEM).
    """
    B = x.shape[0]
    max_tb = max(128, (max_tb // 128) * 128)
    tb, num_tiles = _choose_tiling(B, max_tb)
    b_pad = tb * num_tiles

    # Explicit scoped-VMEM budget: double-buffered f32 x block + resident bf16
    # W1 + bf16 h intermediates + headroom.  Clears v5e's 16 MiB default at
    # tb=2048 and stays well under v7x's 64 MiB physical VMEM.
    est = (2 * tb * INPUT_DIM * 4            # x blocks (double buffered)
           + 2 * INPUT_DIM * HIDDEN_PAD * 2  # W1 buffers
           + 2 * tb * HIDDEN_PAD * 2         # x_bf16 / h intermediates
           + (6 << 20))                      # out/eps/bias blocks + headroom
    vmem_limit = int(min(max(est, 32 << 20), 48 << 20))

    out = pl.pallas_call(
        _encoder_kernel,
        out_shape=jax.ShapeDtypeStruct((OUT_ROWS, b_pad), jnp.float32),
        grid=(num_tiles,),
        in_specs=[
            # x: f32 straight from HBM, tiled along batch.
            pl.BlockSpec((tb, INPUT_DIM), lambda i: (i, 0)),
            # Constant-index blocks below are revisited every grid step, so the
            # pipeline only copies them from HBM once (pl.Buffered(1) would
            # additionally trim ~0.6 MB of double-buffer VMEM if ever needed).
            pl.BlockSpec((INPUT_DIM, HIDDEN_PAD), lambda i: (0, 0)),   # W1 (bf16)
            pl.BlockSpec((1, HIDDEN_PAD), lambda i: (0, 0)),           # b1 (f32)
            pl.BlockSpec((HIDDEN_PAD, OUT_ROWS), lambda i: (0, 0)),    # fused Wm|Wl (bf16, pre-T)
            pl.BlockSpec((1, OUT_ROWS), lambda i: (0, 0)),             # fused bm|bl (f32)
            # eps: tiled along batch, transposed lane-dense inside the kernel.
            pl.BlockSpec((tb, Z_DIM), lambda i: (i, 0)),
        ],
        out_specs=pl.BlockSpec((OUT_ROWS, tb), lambda i: (0, i)),      # packed [8, TB]
        compiler_params=pltpu.CompilerParams(
            dimension_semantics=("parallel",),
            vmem_limit_bytes=vmem_limit,
        ),
    )(x, packed["w1"], packed["b1"], packed["wml"], packed["bml"], eps)

    mean = out[0:Z_DIM, :B].T
    logvar = out[Z_DIM:2 * Z_DIM, :B].T
    z = out[2 * Z_DIM:3 * Z_DIM, :B].T
    return z, mean, logvar


def init_params(key):
    """Deterministic init mimicking nn.Linear's U(-1/sqrt(fan_in), 1/sqrt(fan_in))."""
    k1, k2, k3, k4, k5, k6 = jax.random.split(key, 6)

    def linear(kw, kb, fan_in, fan_out):
        bound = 1.0 / jnp.sqrt(jnp.float32(fan_in))
        # stored transposed: [in, out]
        w_t = jax.random.uniform(kw, (fan_in, fan_out), jnp.float32, -bound, bound)
        b = jax.random.uniform(kb, (1, fan_out), jnp.float32, -bound, bound)
        return w_t, b

    w1_t, b1 = linear(k1, k2, INPUT_DIM, HIDDEN_DIM)
    wm_t, bm = linear(k3, k4, HIDDEN_DIM, Z_DIM)
    wl_t, bl = linear(k5, k6, HIDDEN_DIM, Z_DIM)
    return dict(w1_t=w1_t, b1=b1, wm_t=wm_t, bm=bm, wl_t=wl_t, bl=bl)


def reference_forward(x, params, eps):
    """Pure-JAX f32 reference mirroring the PyTorch forward (eval-mode dropout)."""
    h = jnp.tanh(x @ params["w1_t"] + params["b1"])
    mean = h @ params["wm_t"] + params["bm"]
    logvar = h @ params["wl_t"] + params["bl"]
    z = mean + jnp.exp(0.5 * logvar) * eps
    return z, mean, logvar


if __name__ == "__main__":
    key = jax.random.PRNGKey(0)
    k_param, k_data, _ = jax.random.split(key, 3)

    params = init_params(k_param)
    packed = pack_params(params)

    # B=8: single exact full-array block.  B=256: 2-tile grid (pipelined,
    # megacore-shardable).  Both shapes are small and fully deterministic.
    for B in (8, 256):
        kx, ke = jax.random.split(jax.random.fold_in(k_data, B))
        x = jax.random.normal(kx, (B, INPUT_DIM), jnp.float32)
        eps = jax.random.normal(ke, (B, Z_DIM), jnp.float32)

        z, mean, logvar = gaussian_encoder_forward(x, packed, eps)
        jax.block_until_ready((z, mean, logvar))

        # Sanity-check against a pure-JAX f32 reference.  Tolerances account
        # for the bf16 quantization of x / W1 / h / Wm|Wl inside the kernel.
        z_ref, mean_ref, logvar_ref = reference_forward(x, params, eps)
        assert jnp.allclose(mean, mean_ref, atol=3e-2, rtol=3e-2), f"mean mismatch (B={B})"
        assert jnp.allclose(logvar, logvar_ref, atol=3e-2, rtol=3e-2), f"logvar mismatch (B={B})"
        assert jnp.allclose(z, z_ref, atol=3e-2, rtol=3e-2), f"z mismatch (B={B})"

    print("KERNEL_OK")
</pallas_src>

<mosaic_0001>
module attributes {stable_mosaic.version = 11 : i64} {
  func.func @_encoder_kernel(%arg0: i32, %arg1: memref<8x784xf32, #tpu.memory_space<vmem>>, %arg2: memref<784x384xbf16, #tpu.memory_space<vmem>>, %arg3: memref<1x384xf32, #tpu.memory_space<vmem>>, %arg4: memref<384x8xbf16, #tpu.memory_space<vmem>>, %arg5: memref<1x8xf32, #tpu.memory_space<vmem>>, %arg6: memref<8x2xf32, #tpu.memory_space<vmem>>, %arg7: memref<8x8xf32, #tpu.memory_space<vmem>>) attributes {dimension_semantics = [#tpu.dimension_semantics<parallel>], iteration_bounds = array<i64: 1>, scalar_prefetch = 0 : i64, scratch_operands = 0 : i64, tpu.core_type = #tpu.core_type<tc>, window_params = [{transform_indices = @transform_0, window_bounds = array<i64: 8, 784>}, {pipeline_mode = #tpu.pipeline_mode<synchronous>, transform_indices = @transform_1, window_bounds = array<i64: 784, 384>}, {pipeline_mode = #tpu.pipeline_mode<synchronous>, transform_indices = @transform_2, window_bounds = array<i64: 1, 384>}, {pipeline_mode = #tpu.pipeline_mode<synchronous>, transform_indices = @transform_3, window_bounds = array<i64: 384, 8>}, {pipeline_mode = #tpu.pipeline_mode<synchronous>, transform_indices = @transform_4, window_bounds = array<i64: 1, 8>}, {transform_indices = @transform_5, window_bounds = array<i64: 8, 2>}, {transform_indices = @transform_6, window_bounds = array<i64: 8, 8>}]} {
    %c0 = arith.constant 0 : index
    %c0_0 = arith.constant 0 : index
    %0 = vector.load %arg1[%c0, %c0_0] : memref<8x784xf32, #tpu.memory_space<vmem>>, vector<8x784xf32>
    %1 = arith.truncf %0 : vector<8x784xf32> to vector<8x784xbf16>
    %c0_1 = arith.constant 0 : index
    %c0_2 = arith.constant 0 : index
    %2 = vector.load %arg2[%c0_1, %c0_2] : memref<784x384xbf16, #tpu.memory_space<vmem>>, vector<784x384xbf16>
    %cst = arith.constant dense<0.000000e+00> : vector<8x384xf32>
    %3 = tpu.matmul %1, %2, %cst {dimension_numbers = #tpu.dot_dimension_numbers<[1], [0], [0], [1], [0, 0, 1, 1], [], []>} : vector<8x784xbf16>, vector<784x384xbf16>, vector<8x384xf32> -> vector<8x384xf32>
    %c0_3 = arith.constant 0 : index
    %c0_4 = arith.constant 0 : index
    %4 = vector.load %arg3[%c0_3, %c0_4] : memref<1x384xf32, #tpu.memory_space<vmem>>, vector<1x384xf32>
    %5 = vector.broadcast %4 : vector<1x384xf32> to vector<8x384xf32>
    %6 = arith.addf %3, %5 : vector<8x384xf32>
    %7 = arith.truncf %6 : vector<8x384xf32> to vector<8x384xbf16>
    %8 = math.tanh %7 : vector<8x384xbf16>
    %c0_5 = arith.constant 0 : index
    %c0_6 = arith.constant 0 : index
    %9 = vector.load %arg4[%c0_5, %c0_6] : memref<384x8xbf16, #tpu.memory_space<vmem>>, vector<384x8xbf16>
    %cst_7 = arith.constant dense<0.000000e+00> : vector<8x8xf32>
    %10 = tpu.matmul %8, %9, %cst_7 {dimension_numbers = #tpu.dot_dimension_numbers<[1], [0], [0], [1], [0, 0, 1, 1], [], []>} : vector<8x384xbf16>, vector<384x8xbf16>, vector<8x8xf32> -> vector<8x8xf32>
    %c0_8 = arith.constant 0 : index
    %c0_9 = arith.constant 0 : index
    %11 = vector.load %arg5[%c0_8, %c0_9] : memref<1x8xf32, #tpu.memory_space<vmem>>, vector<1x8xf32>
    %12 = vector.broadcast %11 : vector<1x8xf32> to vector<8x8xf32>
    %13 = arith.addf %10, %12 : vector<8x8xf32>
    %14 = tpu.transpose %13, [1, 0] : vector<8x8xf32> -> vector<8x8xf32>
    %15 = vector.extract_strided_slice %14 {offsets = [0, 0], sizes = [2, 8], strides = [1, 1]} : vector<8x8xf32> to vector<2x8xf32>
    %16 = vector.extract_strided_slice %14 {offsets = [2, 0], sizes = [2, 8], strides = [1, 1]} : vector<8x8xf32> to vector<2x8xf32>
    %c0_10 = arith.constant 0 : index
    %c0_11 = arith.constant 0 : index
    %17 = vector.load %arg6[%c0_10, %c0_11] : memref<8x2xf32, #tpu.memory_space<vmem>>, vector<8x2xf32>
    %18 = tpu.transpose %17, [1, 0] : vector<8x2xf32> -> vector<2x8xf32>
    %cst_12 = arith.constant 5.000000e-01 : f32
    %19 = vector.broadcast %cst_12 : f32 to vector<2x8xf32>
    %20 = arith.mulf %19, %16 : vector<2x8xf32>
    %21 = math.exp %20 : vector<2x8xf32>
    %22 = arith.mulf %21, %18 : vector<2x8xf32>
    %23 = arith.addf %15, %22 : vector<2x8xf32>
    %24 = vector.extract_strided_slice %14 {offsets = [0, 0], sizes = [4, 8], strides = [1, 1]} : vector<8x8xf32> to vector<4x8xf32>
    %c0_13 = arith.constant 0 : index
    %c0_14 = arith.constant 0 : index
    %25 = vector.load %arg7[%c0_13, %c0_14] : memref<8x8xf32, #tpu.memory_space<vmem>>, vector<4x8xf32>
    tpu.vector_store %arg7[%c0_13, %c0_14], %24 {strides = array<i32>} : memref<8x8xf32, #tpu.memory_space<vmem>>, vector<4x8xf32>,
    %c4 = arith.constant 4 : index
    %c0_15 = arith.constant 0 : index
    %26 = vector.load %arg7[%c4, %c0_15] : memref<8x8xf32, #tpu.memory_space<vmem>>, vector<2x8xf32>
    tpu.vector_store %arg7[%c4, %c0_15], %23 {strides = array<i32>} : memref<8x8xf32, #tpu.memory_space<vmem>>, vector<2x8xf32>,
    return
  }
  func.func @transform_0(%arg0: i32) -> (i32, i32) {
    %c0_i32 = arith.constant 0 : i32
    %c0_i32_0 = arith.constant 0 : i32
    return %arg0, %c0_i32 : i32, i32
  }
  func.func @transform_1(%arg0: i32) -> (i32, i32) {
    %c0_i32 = arith.constant 0 : i32
    %c0_i32_0 = arith.constant 0 : i32
    %c0_i32_1 = arith.constant 0 : i32
    return %c0_i32, %c0_i32_0 : i32, i32
  }
  func.func @transform_2(%arg0: i32) -> (i32, i32) {
    %c0_i32 = arith.constant 0 : i32
    %c0_i32_0 = arith.constant 0 : i32
    %c0_i32_1 = arith.constant 0 : i32
    return %c0_i32, %c0_i32_0 : i32, i32
  }
  func.func @transform_3(%arg0: i32) -> (i32, i32) {
    %c0_i32 = arith.constant 0 : i32
    %c0_i32_0 = arith.constant 0 : i32
    %c0_i32_1 = arith.constant 0 : i32
    return %c0_i32, %c0_i32_0 : i32, i32
  }
  func.func @transform_4(%arg0: i32) -> (i32, i32) {
    %c0_i32 = arith.constant 0 : i32
    %c0_i32_0 = arith.constant 0 : i32
    %c0_i32_1 = arith.constant 0 : i32
    return %c0_i32, %c0_i32_0 : i32, i32
  }
  func.func @transform_5(%arg0: i32) -> (i32, i32) {
    %c0_i32 = arith.constant 0 : i32
    %c0_i32_0 = arith.constant 0 : i32
    return %arg0, %c0_i32 : i32, i32
  }
  func.func @transform_6(%arg0: i32) -> (i32, i32) {
    %c0_i32 = arith.constant 0 : i32
    %c0_i32_0 = arith.constant 0 : i32
    return %c0_i32, %arg0 : i32, i32
  }
}

</mosaic_0001>

<bundles_post_ra>
// kernel: tpu_custom_call.1
= control target key start
LH: loop header
LB: loop body
LE: loop exit
PB: predicated region body
PF: predicated region fallthrough
CT: control target
= control target key end

     0   :  { %11 = vsyncpa [#allocation3], 0  ;;  %s2778_s0 = inlined_call_operand.vmem [shape: f32[8,784], index: 0, kind: input, shape index: {}]   ;;  %s2779_s1 = inlined_call_operand.hbm [shape: bf16[784,384], index: 1, kind: input, shape index: {}]   ;;  %s2780_s2 = inlined_call_operand.vmem [shape: f32[1,384], index: 2, kind: input, shape index: {}]   ;;  %s2781_s3 = inlined_call_operand.vmem [shape: bf16[384,8], index: 3, kind: input, shape index: {}]   ;;  %s2782_s4 = inlined_call_operand.vmem [shape: f32[1,8], index: 4, kind: input, shape index: {}]   ;;  %s2783_s5 = inlined_call_operand.vmem [shape: f32[8,2], index: 5, kind: input, shape index: {}]   ;;  %s2784_s6 = inlined_call_operand.hbm [shape: f32[8,8], index: 6, kind: output, shape index: {}]  }
   0x1   :  { %12 = vsyncpa [#allocation4], 0  ;;  %s19_s23 = sshll.u32 %s2779_s1, 4  ;;  %s2588_s24 = smov [#allocation2]   ;;  %s20_s23 = int_to_ptr.hbm [resolvable:$true] %s19_s23 }
   0x2   :  { %s21_s25 = sshll.u32 %s2588_s24, 4  ;;  %s2589_s26 = smov 192   ;;  %s22_s25 = int_to_ptr.vmem [resolvable:$true] %s21_s25 }
   0x3   :  { %s2590_s27 = smov 12  }
   0x4   :  { %27 = dma.hbm_to_vmem [thread:$0]  %s20_s23, 18816, %s22_s25, [#allocation3], %s2589_s26, %s2589_s26, %s2590_s27  }
   0x5   :  { %2584 = dma.done.wait [#allocation3], 18816  }
   0x6   :  { %2585 = vsyncadd [#allocation3], 4294948480  ;;  %v1750_v0 = vld [vmem:[#allocation2 + $0xa8] sm:$0xf]  ;;  %v2373_v1 = vld [vmem:[#allocation2 + $0xb0] sm:$0xf0] }
   0x7   :  { %v1846_v2 = vld [vmem:[#allocation2 + $0x168] sm:$0xf]  ;;  %v1751_v3 = vor.u32 %v2373_v1, %v1750_v0  ;;  %v2397_v4 = vld [vmem:[#allocation2 + $0x170] sm:$0xf0]  ;;  %v1738_v11 = vld [vmem:[#allocation2 + $0x90] sm:$0xf] }
   0x8   :  { %v1942_v5 = vld [vmem:[#allocation2 + $0x228] sm:$0xf]  ;;  %v2421_v6 = vld [vmem:[#allocation2 + $0x230] sm:$0xf0]  ;;  %v1847_v7 = vor.u32 %v2397_v4, %v1846_v2  ;;  %v2370_v13 = vld [vmem:[#allocation2 + $0x98] sm:$0xf0] }
   0x9   :  { %v1943_v8 = vor.u32 %v2421_v6, %v1942_v5  ;;  %v2038_v9 = vld [vmem:[#allocation2 + $0x2e8] sm:$0xf]  ;;  %v2445_v10 = vld [vmem:[#allocation2 + $0x2f0] sm:$0xf0]  ;;  %1047 = vmatpush.bf16.msra.mxu0 %v1751_v3  ;;  %v1834_v14 = vld [vmem:[#allocation2 + $0x150] sm:$0xf]  ;;  %v1739_v16 = vor.u32 %v2370_v13, %v1738_v11 }
   0xa   :  { %v2039_v12 = vor.u32 %v2445_v10, %v2038_v9  ;;  %v2394_v15 = vld [vmem:[#allocation2 + $0x158] sm:$0xf0]  ;;  %1060 = vmatpush.bf16.msra.mxu1 %v1847_v7  ;;  %v1930_v18 = vld [vmem:[#allocation2 + $0x210] sm:$0xf]  ;;  %v1726_v23 = vld [vmem:[#allocation2 + $0x78] sm:$0xf] }
   0xb   :  { %1073 = vmatpush.bf16.msra.mxu2 %v1943_v8  ;;  %v1835_v17 = vor.u32 %v2394_v15, %v1834_v14  ;;  %v2418_v19 = vld [vmem:[#allocation2 + $0x218] sm:$0xf0]  ;;  %v2026_v20 = vld [vmem:[#allocation2 + $0x2d0] sm:$0xf]  ;;  %v2367_v24 = vld [vmem:[#allocation2 + $0x80] sm:$0xf0] }
   0xc   :  { %1086 = vmatpush.bf16.msra.mxu3 %v2039_v12  ;;  %v1931_v21 = vor.u32 %v2418_v19, %v1930_v18  ;;  %v2442_v22 = vld [vmem:[#allocation2 + $0x2d8] sm:$0xf0]  ;;  %v1822_v26 = vld [vmem:[#allocation2 + $0x138] sm:$0xf]  ;;  %v2391_v27 = vld [vmem:[#allocation2 + $0x140] sm:$0xf0]  ;;  %v1727_v29 = vor.u32 %v2367_v24, %v1726_v23 }
   0xd   :  { %v2027_v25 = vor.u32 %v2442_v22, %v2026_v20  ;;  %v1918_v28 = vld [vmem:[#allocation2 + $0x1f8] sm:$0xf]  ;;  %1048 = vmatpush.bf16.msra.mxu0 %v1739_v16  ;;  %v2415_v30 = vld [vmem:[#allocation2 + $0x200] sm:$0xf0]  ;;  %v1823_v33 = vor.u32 %v2391_v27, %v1822_v26  ;;  %v1714_v35 = vld [vmem:[#allocation2 + $0x60] sm:$0xf] }
   0xe   :  { %v2014_v31 = vld [vmem:[#allocation2 + $0x2b8] sm:$0xf]  ;;  %v2439_v32 = vld [vmem:[#allocation2 + $0x2c0] sm:$0xf0]  ;;  %1061 = vmatpush.bf16.msra.mxu1 %v1835_v17  ;;  %v1919_v34 = vor.u32 %v2415_v30, %v1918_v28  ;;  %v2364_v36 = vld [vmem:[#allocation2 + $0x68] sm:$0xf0] }
   0xf   :  { %1074 = vmatpush.bf16.msra.mxu2 %v1931_v21  ;;  %v1810_v37 = vld [vmem:[#allocation2 + $0x120] sm:$0xf]  ;;  %v2015_v38 = vor.u32 %v2439_v32, %v2014_v31  ;;  %v2388_v39 = vld [vmem:[#allocation2 + $0x128] sm:$0xf0]  ;;  %v1715_v44 = vor.u32 %v2364_v36, %v1714_v35  ;;  %v1702_v47 = vld [vmem:[#allocation2 + $0x48] sm:$0xf] }
  0x10   :  { %1087 = vmatpush.bf16.msra.mxu3 %v2027_v25  ;;  %v1906_v40 = vld [vmem:[#allocation2 + $0x1e0] sm:$0xf]  ;;  %v2412_v41 = vld [vmem:[#allocation2 + $0x1e8] sm:$0xf0]  ;;  %v1811_v45 = vor.u32 %v2388_v39, %v1810_v37  ;;  %v2361_v48 = vld [vmem:[#allocation2 + $0x50] sm:$0xf0] }
  0x11   :  { %v2002_v42 = vld [vmem:[#allocation2 + $0x2a0] sm:$0xf]  ;;  %v2436_v43 = vld [vmem:[#allocation2 + $0x2a8] sm:$0xf0]  ;;  %1049 = vmatpush.bf16.msra.mxu0 %v1727_v29  ;;  %v1907_v46 = vor.u32 %v2412_v41, %v1906_v40  ;;  %v1798_v49 = vld [vmem:[#allocation2 + $0x108] sm:$0xf]  ;;  %v1703_v56 = vor.u32 %v2361_v48, %v1702_v47 }
  0x12   :  { %1062 = vmatpush.bf16.msra.mxu1 %v1823_v33  ;;  %v2003_v50 = vor.u32 %v2436_v43, %v2002_v42  ;;  %v2385_v51 = vld [vmem:[#allocation2 + $0x110] sm:$0xf0]  ;;  %v1894_v52 = vld [vmem:[#allocation2 + $0x1c8] sm:$0xf]  ;;  %v1690_v59 = vld [vmem:[#allocation2 + $0x30] sm:$0xf] }
  0x13   :  { %1075 = vmatpush.bf16.msra.mxu2 %v1919_v34  ;;  %v2409_v53 = vld [vmem:[#allocation2 + $0x1d0] sm:$0xf0]  ;;  %v1990_v54 = vld [vmem:[#allocation2 + $0x288] sm:$0xf]  ;;  %v1799_v57 = vor.u32 %v2385_v51, %v1798_v49  ;;  %v2358_v60 = vld [vmem:[#allocation2 + $0x38] sm:$0xf0] }
  0x14   :  { %1088 = vmatpush.bf16.msra.mxu3 %v2015_v38  ;;  %v2433_v55 = vld [vmem:[#allocation2 + $0x290] sm:$0xf0]  ;;  %v1895_v58 = vor.u32 %v2409_v53, %v1894_v52  ;;  %v1786_v61 = vld [vmem:[#allocation2 + $0xf0] sm:$0xf]  ;;  %v2382_v63 = vld [vmem:[#allocation2 + $0xf8] sm:$0xf0]  ;;  %v1691_v4 = vor.u32 %v2358_v60, %v1690_v59 }
  0x15   :  { %1050 = vmatpush.bf16.msra.mxu0 %v1715_v44  ;;  %v1991_v62 = vor.u32 %v2433_v55, %v1990_v54  ;;  %v1882_v0 = vld [vmem:[#allocation2 + $0x1b0] sm:$0xf]  ;;  %v2406_v1 = vld [vmem:[#allocation2 + $0x1b8] sm:$0xf0]  ;;  %v1787_v5 = vor.u32 %v2382_v63, %v1786_v61  ;;  %v1678_v7 = vld [vmem:[#allocation2 + $0x18] sm:$0xf] }
  0x16   :  { %1063 = vmatpush.bf16.msra.mxu1 %v1811_v45  ;;  %v1978_v2 = vld [vmem:[#allocation2 + $0x270] sm:$0xf]  ;;  %v2430_v3 = vld [vmem:[#allocation2 + $0x278] sm:$0xf0]  ;;  %v1883_v6 = vor.u32 %v2406_v1, %v1882_v0  ;;  %v2355_v8 = vld [vmem:[#allocation2 + $0x20] sm:$0xf0] }
  0x17   :  { %1076 = vmatpush.bf16.msra.mxu2 %v1907_v46  ;;  %v1774_v9 = vld [vmem:[#allocation2 + $0xd8] sm:$0xf]  ;;  %v1979_v10 = vor.u32 %v2430_v3, %v1978_v2  ;;  %v2379_v11 = vld [vmem:[#allocation2 + $0xe0] sm:$0xf0]  ;;  %v1679_v16 = vor.u32 %v2355_v8, %v1678_v7  ;;  %v1666_v17 = vld [vmem:[#allocation2] sm:$0xf] }
  0x18   :  { %1089 = vmatpush.bf16.msra.mxu3 %v2003_v50  ;;  %v1870_v12 = vld [vmem:[#allocation2 + $0x198] sm:$0xf]  ;;  %v2403_v13 = vld [vmem:[#allocation2 + $0x1a0] sm:$0xf0]  ;;  %v2352_v18 = vld [vmem:[#allocation2 + $0x8] sm:$0xf0]  ;;  %v1775_v19 = vor.u32 %v2379_v11, %v1774_v9 }
  0x19   :  { %1051 = vmatpush.bf16.msra.mxu0 %v1703_v56  ;;  %v1966_v14 = vld [vmem:[#allocation2 + $0x258] sm:$0xf]  ;;  %v2427_v15 = vld [vmem:[#allocation2 + $0x260] sm:$0xf0]  ;;  %v1871_v20 = vor.u32 %v2403_v13, %v1870_v12  ;;  %v1762_v21 = vld [vmem:[#allocation2 + $0xc0] sm:$0xf]  ;;  %v1667_v31 = vor.u32 %v2352_v18, %v1666_v17 }
  0x1a   :  { %1064 = vmatpush.bf16.msra.mxu1 %v1799_v57  ;;  %v2376_v22 = vld [vmem:[#allocation2 + $0xc8] sm:$0xf0]  ;;  %v1858_v23 = vld [vmem:[#allocation2 + $0x180] sm:$0xf]  ;;  %v1967_v24 = vor.u32 %v2427_v15, %v1966_v14  ;;  %v2134_v28 = vld [vmem:[#allocation2 + $0x3a8] sm:$0xf] }
  0x1b   :  { %1077 = vmatpush.bf16.msra.mxu2 %v1895_v58  ;;  %v2400_v25 = vld [vmem:[#allocation2 + $0x188] sm:$0xf0]  ;;  %v1954_v26 = vld [vmem:[#allocation2 + $0x240] sm:$0xf]  ;;  %v2469_v29 = vld [vmem:[#allocation2 + $0x3b0] sm:$0xf0]  ;;  %v1763_v35 = vor.u32 %v2376_v22, %v1762_v21 }
  0x1c   :  { %1090 = vmatpush.bf16.msra.mxu3 %v1991_v62  ;;  %v2424_v27 = vld [vmem:[#allocation2 + $0x248] sm:$0xf0]  ;;  %v2230_v30 = vld [vmem:[#allocation2 + $0x468] sm:$0xf]  ;;  %v2493_v32 = vld [vmem:[#allocation2 + $0x470] sm:$0xf0]  ;;  %v1859_v36 = vor.u32 %v2400_v25, %v1858_v23  ;;  %v2135_v40 = vor.u32 %v2469_v29, %v2134_v28 }
  0x1d   :  { %1052 = vmatpush.bf16.msra.mxu0 %v1691_v4  ;;  %v2372_v33 = vld [vmem:[#allocation2 + $0xac] sm:$0xf]  ;;  %v1752_v34 = vld [vmem:[#allocation2 + $0xb4] sm:$0xf0]  ;;  %v2242_v37 = vld [vmem:[#allocation2 + $0x480] sm:$0xf]  ;;  %v1955_v39 = vor.u32 %v2424_v27, %v1954_v26  ;;  %v2231_v44 = vor.u32 %v2493_v32, %v2230_v30 }
  0x1e   :  { %1065 = vmatpush.bf16.msra.mxu1 %v1787_v5  ;;  %v2496_v38 = vld [vmem:[#allocation2 + $0x488] sm:$0xf0]  ;;  %v43_v41 = vld [vmem:[%s2778_s0 + $0x10] sm:$0xff]  ;;  %v1848_v43 = vld [vmem:[#allocation2 + $0x174] sm:$0xf0]  ;;  %v1755_v45 = vor.u32 %v2372_v33, %v1752_v34  ;;  %vm1043_vm0 = vcmask 130048  }
  0x1f   :  { %1078 = vmatpush.bf16.msra.mxu2 %v1883_v6  ;;  %v2396_v42 = vld [vmem:[#allocation2 + $0x16c] sm:$0xf]  ;;  %v2122_v46 = vld [vmem:[#allocation2 + $0x390] sm:$0xf]  ;;  %v2466_v47 = vld [vmem:[#allocation2 + $0x398] sm:$0xf0]  ;;  %v2243_v49 = vor.u32 %v2496_v38, %v2242_v37  ;;  %v2633_v53 = vpack.c.bf16 %v43_v41, %v43_v41 }
  0x20   :  { %1091 = vmatpush.bf16.msra.mxu3 %v1979_v10  ;;  %v2218_v48 = vld [vmem:[#allocation2 + $0x450] sm:$0xf]  ;;  %v2490_v50 = vld [vmem:[#allocation2 + $0x458] sm:$0xf0]  ;;  %v2369_v51 = vld [vmem:[#allocation2 + $0x94] sm:$0xf]  ;;  %v1851_v55 = vor.u32 %v2396_v42, %v1848_v43  ;;  %v2123_v56 = vor.u32 %v2466_v47, %v2122_v46 }
  0x21   :  { %1053 = vmatpush.bf16.msra.mxu0 %v1679_v16  ;;  %v1740_v52 = vld [vmem:[#allocation2 + $0x9c] sm:$0xf0]  ;;  %v2393_v57 = vld [vmem:[#allocation2 + $0x154] sm:$0xf]  ;;  %v2110_v59 = vld [vmem:[#allocation2 + $0x378] sm:$0xf]  ;;  %v2219_v61 = vor.u32 %v2490_v50, %v2218_v48 }
  0x22   :  { %1066 = vmatpush.bf16.msra.mxu1 %v1775_v19  ;;  %v41_v54 = vld [vmem:[%s2778_s0] sm:$0xff]  ;;  %v1743_v62 = vor.u32 %v2369_v51, %v1740_v52  ;;  %v2206_v0 = vld [vmem:[#allocation2 + $0x438] sm:$0xf]  ;;  %v2366_v2 = vld [vmem:[#allocation2 + $0x7c] sm:$0xf]  ;;  %vm1643_vm1 = vcmask 60416  }
  0x23   :  { %1079 = vmatpush.bf16.msra.mxu2 %v1871_v20  ;;  %v1836_v58 = vld [vmem:[#allocation2 + $0x15c] sm:$0xf0]  ;;  %v2638_v60 = vpack.c.bf16 %v41_v54, %v41_v54  ;;  %v2463_v63 = vld [vmem:[#allocation2 + $0x380] sm:$0xf0]  ;;  %v1728_v3 = vld [vmem:[#allocation2 + $0x84] sm:$0xf0] }
  0x24   :  { %1092 = vmatpush.bf16.msra.mxu3 %v1967_v24  ;;  %v2487_v1 = vld [vmem:[#allocation2 + $0x440] sm:$0xf0]  ;;  %v42_v4 = vld [vmem:[%s2778_s0 + $0x8] sm:$0xff]  ;;  %v1839_v6 = vor.u32 %v2393_v57, %v1836_v58  ;;  %v2111_v7 = vor.u32 %v2463_v63, %v2110_v59  ;;  %v2390_v8 = vld [vmem:[#allocation2 + $0x13c] sm:$0xf]  ;;  %v1731_v12 = vor.u32 %v2366_v2, %v1728_v3  ;;  %s1654_s18 = sshll.u32 %s2784_s6, 4  ;;  %s1655_s18 = int_to_ptr.hbm [resolvable:$true] %s1654_s18 }
  0x25   :  { %1054 = vmatpush.bf16.msra.mxu0 %v1667_v31  ;;  %v2645_v5 = vpack.c.bf16 %v42_v4, %v42_v4  ;;  %v1824_v9 = vld [vmem:[#allocation2 + $0x144] sm:$0xf0]  ;;  %v2098_v10 = vld [vmem:[#allocation2 + $0x360] sm:$0xf]  ;;  %v2207_v11 = vor.u32 %v2487_v1, %v2206_v0  ;;  %v2460_v13 = vld [vmem:[#allocation2 + $0x368] sm:$0xf0] }
  0x26   :  { %1067 = vmatpush.bf16.msra.mxu1 %v1763_v35  ;;  %v2194_v14 = vld [vmem:[#allocation2 + $0x420] sm:$0xf]  ;;  %v44_v15 = vld [vmem:[%s2778_s0 + $0x18] sm:$0xff]  ;;  %v2484_v16 = vld [vmem:[#allocation2 + $0x428] sm:$0xf0]  ;;  %v1827_v20 = vor.u32 %v2390_v8, %v1824_v9  ;;  %v2099_v21 = vor.u32 %v2460_v13, %v2098_v10  ;;  %vm1645_vm2 = vcmask 58368  }
  0x27   :  { %1080 = vmatpush.bf16.msra.mxu2 %v1859_v36  ;;  %v2363_v17 = vld [vmem:[#allocation2 + $0x64] sm:$0xf]  ;;  %v1716_v18 = vld [vmem:[#allocation2 + $0x6c] sm:$0xf0]  ;;  %v2651_v19 = vpack.c.bf16 %v44_v15, %v44_v15  ;;  %v2195_v24 = vor.u32 %v2484_v16, %v2194_v14  ;;  %v2086_v26 = vld [vmem:[#allocation2 + $0x348] sm:$0xf] }
  0x28   :  { %1093 = vmatpush.bf16.msra.mxu3 %v1955_v39  ;;  %1055 = vmatmul.bf16.vlgmr.msra.gmra.mxu0 %v2638_v60  ;;  %v2387_v22 = vld [vmem:[#allocation2 + $0x124] sm:$0xf]  ;;  %v1812_v23 = vld [vmem:[#allocation2 + $0x12c] sm:$0xf0]  ;;  %v1719_v25 = vor.u32 %v2363_v17, %v1716_v18  ;;  %v2457_v27 = vld [vmem:[#allocation2 + $0x350] sm:$0xf0] }
  0x29   :  { %1099 = vmatpush.bf16.msrb.mxu0 %v2135_v40  ;;  %1068 = vmatmul.bf16.vlgmr.msra.gmra.mxu1 %v2645_v5  ;;  %v2182_v28 = vld [vmem:[#allocation2 + $0x408] sm:$0xf]  ;;  %v2481_v29 = vld [vmem:[#allocation2 + $0x410] sm:$0xf0]  ;;  %v2360_v30 = vld [vmem:[#allocation2 + $0x4c] sm:$0xf]  ;;  %v1815_v32 = vor.u32 %v2387_v22, %v1812_v23  ;;  %v2087_v33 = vor.u32 %v2457_v27, %v2086_v26 }
  0x2a   :  { %1112 = vmatpush.bf16.msrb.mxu1 %v2231_v44  ;;  %1081 = vmatmul.bf16.vlgmr.msra.gmra.mxu2 %v2633_v53  ;;  %v1704_v31 = vld [vmem:[#allocation2 + $0x54] sm:$0xf0]  ;;  %v2384_v34 = vld [vmem:[#allocation2 + $0x10c] sm:$0xf]  ;;  %v47_v36 = vld [vmem:[%s2778_s0 + $0x30] sm:$0xff]  ;;  %v2183_v37 = vor.u32 %v2481_v29, %v2182_v28 }
  0x2b   :  { %1132 = vmatpush.bf16.msrb.mxu2 %v2243_v49  ;;  %1094 = vmatmul.bf16.vlgmr.msra.gmra.mxu3 %v2651_v19  ;;  %v1800_v35 = vld [vmem:[#allocation2 + $0x114] sm:$0xf0]  ;;  %v1707_v38 = vor.u32 %v2360_v30, %v1704_v31  ;;  %v2074_v39 = vld [vmem:[#allocation2 + $0x330] sm:$0xf]  ;;  %v2454_v40 = vld [vmem:[#allocation2 + $0x338] sm:$0xf0] }
  0x2c   :  { %1138 = vmatpush.bf16.msrb.mxu3 %v1755_v45  ;;  %v2170_v41 = vld [vmem:[#allocation2 + $0x3f0] sm:$0xf]  ;;  %v2478_v42 = vld [vmem:[#allocation2 + $0x3f8] sm:$0xf0]  ;;  %v2357_v43 = vld [vmem:[#allocation2 + $0x34] sm:$0xf]  ;;  %v2657_v45 = vpack.c.bf16 %v47_v36, %v47_v36  ;;  %v1803_v46 = vor.u32 %v2384_v34, %v1800_v35  ;;  %v2075_v47 = vor.u32 %v2454_v40, %v2074_v39 }
  0x2d   :  { %1100 = vmatpush.bf16.msrb.mxu0 %v2123_v56  ;;  %v1692_v44 = vld [vmem:[#allocation2 + $0x3c] sm:$0xf0]  ;;  %v2381_v48 = vld [vmem:[#allocation2 + $0xf4] sm:$0xf]  ;;  %v2171_v50 = vor.u32 %v2478_v42, %v2170_v41  ;;  %v2062_v52 = vld [vmem:[#allocation2 + $0x318] sm:$0xf] }
  0x2e   :  { %1113 = vmatpush.bf16.msrb.mxu1 %v2219_v61  ;;  %v1788_v49 = vld [vmem:[#allocation2 + $0xfc] sm:$0xf0]  ;;  %v1695_v51 = vor.u32 %v2357_v43, %v1692_v44  ;;  %v2451_v54 = vld [vmem:[#allocation2 + $0x320] sm:$0xf0]  ;;  %v2354_v57 = vld [vmem:[#allocation2 + $0x1c] sm:$0xf] }
  0x2f   :  { %1151 = vmatpush.bf16.msra.mxu2 %v1851_v55  ;;  %v2158_v55 = vld [vmem:[#allocation2 + $0x3d8] sm:$0xf]  ;;  %v2475_v56 = vld [vmem:[#allocation2 + $0x3e0] sm:$0xf0]  ;;  %v1680_v58 = vld [vmem:[#allocation2 + $0x24] sm:$0xf0]  ;;  %v1791_v59 = vor.u32 %v2381_v48, %v1788_v49  ;;  %v2063_v61 = vor.u32 %v2451_v54, %v2062_v52 }
  0x30   :  { %1139 = vmatpush.bf16.msrb.mxu3 %v1743_v62  ;;  %v2378_v62 = vld [vmem:[#allocation2 + $0xdc] sm:$0xf]  ;;  %v1776_v63 = vld [vmem:[#allocation2 + $0xe4] sm:$0xf0]  ;;  %v2050_v0 = vld [vmem:[#allocation2 + $0x300] sm:$0xf]  ;;  %v2159_v1 = vor.u32 %v2475_v56, %v2158_v55  ;;  %v1683_v2 = vor.u32 %v2354_v57, %v1680_v58 }
  0x31   :  { %1101 = vmatpush.bf16.msrb.mxu0 %v2111_v7  ;;  %v2448_v3 = vld [vmem:[#allocation2 + $0x308] sm:$0xf0]  ;;  %v2146_v4 = vld [vmem:[#allocation2 + $0x3c0] sm:$0xf]  ;;  %v2351_v7 = vld [vmem:[#allocation2 + $0x4] sm:$0xf]  ;;  %v1779_v13 = vor.u32 %v2378_v62, %v1776_v63 }
  0x32   :  { %1114 = vmatpush.bf16.msrb.mxu1 %v2207_v11  ;;  %v1668_v8 = vld [vmem:[#allocation2 + $0xc] sm:$0xf0]  ;;  %v2420_v9 = vld [vmem:[#allocation2 + $0x22c] sm:$0xf]  ;;  %v1944_v10 = vld [vmem:[#allocation2 + $0x234] sm:$0xf0]  ;;  %v2051_v14 = vor.u32 %v2448_v3, %v2050_v0 }
  0x33   :  { %1152 = vmatpush.bf16.msra.mxu2 %v1839_v6  ;;  %v2472_v6 = vld [vmem:[#allocation2 + $0x3c8] sm:$0xf0]  ;;  %v2136_v16 = vld [vmem:[#allocation2 + $0x3b4] sm:$0xf0]  ;;  %v45_v17 = vld [vmem:[%s2778_s0 + $0x20] sm:$0xff] }
  0x34   :  { %1140 = vmatpush.bf16.msrb.mxu3 %v1731_v12  ;;  %v2444_v11 = vld [vmem:[#allocation2 + $0x2ec] sm:$0xf]  ;;  %v2040_v12 = vld [vmem:[#allocation2 + $0x2f4] sm:$0xf0]  ;;  %v2147_v18 = vor.u32 %v2472_v6, %v2146_v4  ;;  %v1764_v22 = vld [vmem:[#allocation2 + $0xcc] sm:$0xf0]  ;;  %v2667_v30 = vpack.c.bf16 %v45_v17, %v45_v17 }
  0x35   :  { %1102 = vmatpush.bf16.msrb.mxu0 %v2099_v21  ;;  %v2468_v15 = vld [vmem:[#allocation2 + $0x3ac] sm:$0xf]  ;;  %v2375_v21 = vld [vmem:[#allocation2 + $0xc4] sm:$0xf]  ;;  %v2232_v27 = vld [vmem:[#allocation2 + $0x474] sm:$0xf0] }
  0x36   :  { %1115 = vmatpush.bf16.msrb.mxu1 %v2195_v24  ;;  %v46_v23 = vld [vmem:[%s2778_s0 + $0x28] sm:$0xff]  ;;  %v1947_v24 = vor.u32 %v2420_v9, %v1944_v10  ;;  %v2417_v28 = vld [vmem:[#allocation2 + $0x214] sm:$0xf]  ;;  %v2139_v29 = vor.u32 %v2468_v15, %v2136_v16  ;;  %v1932_v31 = vld [vmem:[#allocation2 + $0x21c] sm:$0xf0]  ;;  %v1767_v34 = vor.u32 %v2375_v21, %v1764_v22 }
  0x37   :  { %1153 = vmatpush.bf16.msra.mxu2 %v1827_v20  ;;  %v1671_v20 = vor.u32 %v2351_v7, %v1668_v8  ;;  %v2492_v26 = vld [vmem:[#allocation2 + $0x46c] sm:$0xf]  ;;  %v2669_v35 = vpack.c.bf16 %v46_v23, %v46_v23  ;;  %v2465_v36 = vld [vmem:[#allocation2 + $0x394] sm:$0xf]  ;;  %v1935_v39 = vor.u32 %v2417_v28, %v1932_v31  ;;  %v2220_v42 = vld [vmem:[#allocation2 + $0x45c] sm:$0xf0] }
  0x38   :  { %1141 = vmatpush.bf16.msrb.mxu3 %v1719_v25  ;;  %v2043_v25 = vor.u32 %v2444_v11, %v2040_v12  ;;  %v2489_v41 = vld [vmem:[#allocation2 + $0x454] sm:$0xf]  ;;  %v2414_v43 = vld [vmem:[#allocation2 + $0x1fc] sm:$0xf]  ;;  %v2016_v48 = vld [vmem:[#allocation2 + $0x2c4] sm:$0xf0] }
  0x39   :  { %1103 = vmatpush.bf16.msrb.mxu0 %v2087_v33  ;;  %v2028_v33 = vld [vmem:[#allocation2 + $0x2dc] sm:$0xf0]  ;;  %v2462_v49 = vld [vmem:[#allocation2 + $0x37c] sm:$0xf]  ;;  %v2208_v56 = vld [vmem:[#allocation2 + $0x444] sm:$0xf0] }
  0x3a   :  { %1116 = vmatpush.bf16.msrb.mxu1 %v2183_v37  ;;  %2252 = vmatmul.msk.bf16.vlgmr.msrb.gmra.mxu2 %vm1043_vm0, %v2657_v45  ;;  %v2124_v37 = vld [vmem:[#allocation2 + $0x39c] sm:$0xf0]  ;;  %v2486_v55 = vld [vmem:[#allocation2 + $0x43c] sm:$0xf]  ;;  %v2411_v57 = vld [vmem:[#allocation2 + $0x1e4] sm:$0xf] }
  0x3b   :  { %1154 = vmatpush.bf16.msra.mxu2 %v1815_v32  ;;  %v2441_v32 = vld [vmem:[#allocation2 + $0x2d4] sm:$0xf]  ;;  %v2127_v44 = vor.u32 %v2465_v36, %v2124_v37  ;;  %v2004_v62 = vld [vmem:[#allocation2 + $0x2ac] sm:$0xf0]  ;;  %v2459_v63 = vld [vmem:[#allocation2 + $0x364] sm:$0xf] }
  0x3c   :  { %1142 = vmatpush.bf16.msrb.mxu3 %v1707_v38  ;;  %v2235_v38 = vor.u32 %v2492_v26, %v2232_v27  ;;  %v2031_v40 = vor.u32 %v2441_v32, %v2028_v33  ;;  %v2100_v0 = vld [vmem:[#allocation2 + $0x36c] sm:$0xf0]  ;;  %v2483_v4 = vld [vmem:[#allocation2 + $0x424] sm:$0xf]  ;;  %v2408_v7 = vld [vmem:[#allocation2 + $0x1cc] sm:$0xf] }
  0x3d   :  { %1104 = vmatpush.bf16.msrb.mxu0 %v2075_v47  ;;  %v2438_v47 = vld [vmem:[#allocation2 + $0x2bc] sm:$0xf]  ;;  %v2196_v6 = vld [vmem:[#allocation2 + $0x42c] sm:$0xf0]  ;;  %v2103_v8 = vor.u32 %v2459_v63, %v2100_v0  ;;  %v1896_v9 = vld [vmem:[#allocation2 + $0x1d4] sm:$0xf0] }
  0x3e   :  { %1117 = vmatpush.bf16.msrb.mxu1 %v2171_v50  ;;  %v2112_v50 = vld [vmem:[#allocation2 + $0x384] sm:$0xf0]  ;;  %v2019_v54 = vor.u32 %v2438_v47, %v2016_v48  ;;  %v2432_v10 = vld [vmem:[#allocation2 + $0x28c] sm:$0xf]  ;;  %v1992_v11 = vld [vmem:[#allocation2 + $0x294] sm:$0xf0]  ;;  %v1899_v15 = vor.u32 %v2408_v7, %v1896_v9 }
  0x3f   :  { %1155 = vmatpush.bf16.msra.mxu2 %v1803_v46  ;;  %v1920_v46 = vld [vmem:[#allocation2 + $0x204] sm:$0xf0]  ;;  %v2115_v58 = vor.u32 %v2462_v49, %v2112_v50  ;;  %v2456_v12 = vld [vmem:[#allocation2 + $0x34c] sm:$0xf]  ;;  %v1995_v16 = vor.u32 %v2432_v10, %v1992_v11  ;;  %v1884_v22 = vld [vmem:[#allocation2 + $0x1bc] sm:$0xf0] }
  0x40   :  { %1143 = vmatpush.bf16.msrb.mxu3 %v1695_v51  ;;  %v2223_v51 = vor.u32 %v2489_v41, %v2220_v42  ;;  %v1923_v52 = vor.u32 %v2414_v43, %v1920_v46  ;;  %v2480_v17 = vld [vmem:[#allocation2 + $0x40c] sm:$0xf]  ;;  %v2429_v23 = vld [vmem:[#allocation2 + $0x274] sm:$0xf]  ;;  %v2076_v26 = vld [vmem:[#allocation2 + $0x33c] sm:$0xf0] }
  0x41   :  { %1105 = vmatpush.bf16.msrb.mxu0 %v2063_v61  ;;  %v2435_v61 = vld [vmem:[#allocation2 + $0x2a4] sm:$0xf]  ;;  %v2477_v31 = vld [vmem:[#allocation2 + $0x3f4] sm:$0xf]  ;;  %v2172_v32 = vld [vmem:[#allocation2 + $0x3fc] sm:$0xf0] }
  0x42   :  { %1118 = vmatpush.bf16.msrb.mxu1 %v2159_v1  ;;  %v2211_v1 = vor.u32 %v2486_v55, %v2208_v56  ;;  %v2007_v3 = vor.u32 %v2435_v61, %v2004_v62  ;;  %v2402_v33 = vld [vmem:[#allocation2 + $0x19c] sm:$0xf]  ;;  %v1872_v36 = vld [vmem:[#allocation2 + $0x1a4] sm:$0xf0]  ;;  %v2175_v41 = vor.u32 %v2477_v31, %v2172_v32  ;;  %v2399_v47 = vld [vmem:[#allocation2 + $0x184] sm:$0xf] }
  0x43   :  { %1156 = vmatpush.bf16.msra.mxu2 %v1791_v59  ;;  %v1908_v59 = vld [vmem:[#allocation2 + $0x1ec] sm:$0xf0]  ;;  %v2426_v37 = vld [vmem:[#allocation2 + $0x25c] sm:$0xf]  ;;  %v2160_v43 = vld [vmem:[#allocation2 + $0x3e4] sm:$0xf0] }
  0x44   :  { %1144 = vmatpush.bf16.msrb.mxu3 %v1683_v2  ;;  %v1911_v2 = vor.u32 %v2411_v57, %v1908_v59  ;;  %v2474_v42 = vld [vmem:[#allocation2 + $0x3dc] sm:$0xf]  ;;  %v1860_v48 = vld [vmem:[#allocation2 + $0x18c] sm:$0xf0]  ;;  %v2423_v49 = vld [vmem:[#allocation2 + $0x244] sm:$0xf] }
  0x45   :  { %1106 = vmatpush.bf16.msrb.mxu0 %v2051_v14  ;;  %v2199_v14 = vor.u32 %v2483_v4, %v2196_v6  ;;  %v1758_v55 = vld [vmem:[#allocation2 + $0xb0] sm:$0xf]  ;;  %v2374_v56 = vld [vmem:[#allocation2 + $0xb8] sm:$0xf0]  ;;  %v2495_v57 = vld [vmem:[#allocation2 + $0x484] sm:$0xf]  ;;  %v1863_v63 = vor.u32 %v2399_v47, %v1860_v48 }
  0x46   :  { %1119 = vmatpush.bf16.msrb.mxu1 %v2147_v18  ;;  %v2184_v18 = vld [vmem:[#allocation2 + $0x414] sm:$0xf0]  ;;  %v2244_v59 = vld [vmem:[#allocation2 + $0x48c] sm:$0xf0]  ;;  %v2422_v62 = vld [vmem:[#allocation2 + $0x238] sm:$0xf0]  ;;  %v1759_v4 = vor.u32 %v2374_v56, %v1758_v55 }
  0x47   :  { %1157 = vmatpush.bf16.msra.mxu2 %v1779_v13  ;;  %v2088_v13 = vld [vmem:[#allocation2 + $0x354] sm:$0xf0]  ;;  %v2187_v27 = vor.u32 %v2480_v17, %v2184_v18  ;;  %v1950_v61 = vld [vmem:[#allocation2 + $0x230] sm:$0xf]  ;;  %v2247_v7 = vor.u32 %v2495_v57, %v2244_v59  ;;  %v2371_v10 = vld [vmem:[#allocation2 + $0xa0] sm:$0xf0] }
  0x48   :  { %1145 = vmatpush.bf16.msrb.mxu3 %v1671_v20  ;;  %1107 = vmatmul.bf16.vlgmr.msrb.gmra.mxu0 %v2667_v30  ;;  %v2405_v20 = vld [vmem:[#allocation2 + $0x1b4] sm:$0xf]  ;;  %v2091_v21 = vor.u32 %v2456_v12, %v2088_v13  ;;  %v1854_v6 = vld [vmem:[#allocation2 + $0x170] sm:$0xf]  ;;  %v1746_v9 = vld [vmem:[#allocation2 + $0x98] sm:$0xf]  ;;  %v1951_v11 = vor.u32 %v2422_v62, %v1950_v61 }
  0x49   :  { %1164 = vmatpush.bf16.msra.mxu0 %v1947_v24  ;;  %1120 = vmatmul.bf16.vlgmr.msrb.gmra.mxu1 %v2669_v35  ;;  %v1980_v24 = vld [vmem:[#allocation2 + $0x27c] sm:$0xf0]  ;;  %v1887_v28 = vor.u32 %v2405_v20, %v1884_v22  ;;  %v1938_v13 = vld [vmem:[#allocation2 + $0x218] sm:$0xf]  ;;  %v1747_v18 = vor.u32 %v2371_v10, %v1746_v9  ;;  %v1818_v47 = vld [vmem:[#allocation2 + $0x128] sm:$0xf] }
  0x4a   :  { %1177 = vmatpush.bf16.msra.mxu1 %v2043_v25  ;;  %v2453_v25 = vld [vmem:[#allocation2 + $0x334] sm:$0xf]  ;;  %v1842_v20 = vld [vmem:[#allocation2 + $0x158] sm:$0xf]  ;;  %v1734_v22 = vld [vmem:[#allocation2 + $0x80] sm:$0xf] }
  0x4b   :  { %1158 = vmatpush.bf16.msra.mxu2 %v1767_v34  ;;  %1146 = vmatmul.bf16.vlgmr.msrb.gmra.mxu3 %v2638_v60  ;;  %v2079_v34 = vor.u32 %v2453_v25, %v2076_v26  ;;  %v1926_v26 = vld [vmem:[#allocation2 + $0x200] sm:$0xf]  ;;  %v2389_v48 = vld [vmem:[#allocation2 + $0x130] sm:$0xf0]  ;;  %v2410_v55 = vld [vmem:[#allocation2 + $0x1d8] sm:$0xf0] }
  0x4c   :  { %1190 = vmatpush.bf16.msra.mxu3 %v2139_v29  ;;  %v1983_v29 = vor.u32 %v2429_v23, %v1980_v24  ;;  %v2368_v23 = vld [vmem:[#allocation2 + $0x88] sm:$0xf0]  ;;  %v2010_v56 = vld [vmem:[#allocation2 + $0x2a8] sm:$0xf]  ;;  %v2437_v57 = vld [vmem:[#allocation2 + $0x2b0] sm:$0xf0] }
  0x4d   :  { %1165 = vmatpush.bf16.msra.mxu0 %v1935_v39  ;;  %v2450_v39 = vld [vmem:[#allocation2 + $0x31c] sm:$0xf]  ;;  %v1735_v32 = vor.u32 %v2368_v23, %v1734_v22  ;;  %v1806_v61 = vld [vmem:[#allocation2 + $0x110] sm:$0xf]  ;;  %v1794_v10 = vld [vmem:[#allocation2 + $0xf8] sm:$0xf] }
  0x4e   :  { %1178 = vmatpush.bf16.msra.mxu1 %v2031_v40  ;;  %1159 = vmatmul.bf16.vlgmr.msra.gmra.mxu2 %v2645_v5  ;;  %v2064_v40 = vld [vmem:[#allocation2 + $0x324] sm:$0xf0]  ;;  %v2386_v62 = vld [vmem:[#allocation2 + $0x118] sm:$0xf0]  ;;  %v1782_v23 = vld [vmem:[#allocation2 + $0xe0] sm:$0xf] }
  0x4f   :  { %1203 = vmatpush.bf16.msrb.mxu2 %v2235_v38  ;;  %v1968_v38 = vld [vmem:[#allocation2 + $0x264] sm:$0xf0]  ;;  %v2067_v50 = vor.u32 %v2450_v39, %v2064_v40 }
  0x50   :  { %1191 = vmatpush.bf16.msra.mxu3 %v2127_v44  ;;  %v1875_v44 = vor.u32 %v2402_v33, %v1872_v36  ;;  %v1971_v46 = vor.u32 %v2426_v37, %v1968_v38  ;;  %v1830_v33 = vld [vmem:[#allocation2 + $0x140] sm:$0xf]  ;;  %v1722_v36 = vld [vmem:[#allocation2 + $0x68] sm:$0xf]  ;;  %v2365_v37 = vld [vmem:[#allocation2 + $0x70] sm:$0xf0] }
  0x51   :  { %1166 = vmatpush.bf16.msra.mxu0 %v1923_v52  ;;  %v2447_v52 = vld [vmem:[#allocation2 + $0x304] sm:$0xf]  ;;  %v1914_v40 = vld [vmem:[#allocation2 + $0x1e8] sm:$0xf] }
  0x52   :  { %1179 = vmatpush.bf16.msra.mxu1 %v2019_v54  ;;  %v2052_v54 = vld [vmem:[#allocation2 + $0x30c] sm:$0xf0] }
  0x53   :  { %1204 = vmatpush.bf16.msrb.mxu2 %v2223_v51  ;;  %v1956_v51 = vld [vmem:[#allocation2 + $0x24c] sm:$0xf0] }
  0x54   :  { %1192 = vmatpush.bf16.msra.mxu3 %v2115_v58  ;;  %v2163_v58 = vor.u32 %v2474_v42, %v2160_v43  ;;  %v1959_v0 = vor.u32 %v2423_v49, %v1956_v51  ;;  %v2022_v42 = vld [vmem:[#allocation2 + $0x2c0] sm:$0xf]  ;;  %v2440_v43 = vld [vmem:[#allocation2 + $0x2c8] sm:$0xf0]  ;;  %v1710_v49 = vld [vmem:[#allocation2 + $0x50] sm:$0xf] }
  0x55   :  { %1167 = vmatpush.bf16.msra.mxu0 %v1911_v2  ;;  %v2148_v2 = vld [vmem:[#allocation2 + $0x3cc] sm:$0xf0] }
  0x56   :  { %1180 = vmatpush.bf16.msra.mxu1 %v2007_v3  ;;  %v2055_v3 = vor.u32 %v2447_v52, %v2052_v54  ;;  %v2023_v52 = vor.u32 %v2440_v43, %v2022_v42  ;;  %v1902_v54 = vld [vmem:[#allocation2 + $0x1d0] sm:$0xf]  ;;  %v1770_v42 = vld [vmem:[#allocation2 + $0xc8] sm:$0xf]  ;;  %v2377_v43 = vld [vmem:[#allocation2 + $0xd0] sm:$0xf0] }
  0x57   :  { %1205 = vmatpush.bf16.msrb.mxu2 %v2211_v1  ;;  %v2471_v1 = vld [vmem:[#allocation2 + $0x3c4] sm:$0xf] }
  0x58   :  { %1193 = vmatpush.bf16.msra.mxu3 %v2103_v8  ;;  %v2398_v8 = vld [vmem:[#allocation2 + $0x178] sm:$0xf0]  ;;  %v2151_v12 = vor.u32 %v2471_v1, %v2148_v2  ;;  %v1903_v1 = vor.u32 %v2410_v55, %v1902_v54  ;;  %v2011_v2 = vor.u32 %v2437_v57, %v2010_v56  ;;  %v2425_v54 = vld [vmem:[#allocation2 + $0x250] sm:$0xf0]  ;;  %v1771_v55 = vor.u32 %v2377_v43, %v1770_v42 }
  0x59   :  { %1168 = vmatpush.bf16.msra.mxu0 %v1899_v15  ;;  %v2046_v15 = vld [vmem:[#allocation2 + $0x2f0] sm:$0xf]  ;;  %v1855_v17 = vor.u32 %v2398_v8, %v1854_v6  ;;  %v1807_v8 = vor.u32 %v2386_v62, %v1806_v61  ;;  %v2118_v61 = vld [vmem:[#allocation2 + $0x380] sm:$0xf]  ;;  %v2464_v62 = vld [vmem:[#allocation2 + $0x388] sm:$0xf0] }
  0x5a   :  { %1181 = vmatpush.bf16.msra.mxu1 %v1995_v16  ;;  %v2446_v16 = vld [vmem:[#allocation2 + $0x2f8] sm:$0xf0]  ;;  %v1998_v6 = vld [vmem:[#allocation2 + $0x290] sm:$0xf] }
  0x5b   :  { %1206 = vmatpush.bf16.msrb.mxu2 %v2199_v14  ;;  %v2419_v14 = vld [vmem:[#allocation2 + $0x220] sm:$0xf0]  ;;  %v2047_v25 = vor.u32 %v2446_v16, %v2046_v15  ;;  %v1878_v16 = vld [vmem:[#allocation2 + $0x1a0] sm:$0xf] }
  0x5c   :  { %1194 = vmatpush.bf16.msra.mxu3 %v2091_v21  ;;  %v2395_v21 = vld [vmem:[#allocation2 + $0x160] sm:$0xf0]  ;;  %v1939_v24 = vor.u32 %v2419_v14, %v1938_v13  ;;  %v2356_v13 = vld [vmem:[#allocation2 + $0x28] sm:$0xf0] }
  0x5d   :  { %1169 = vmatpush.bf16.msra.mxu0 %v1887_v28  ;;  %v2034_v28 = vld [vmem:[#allocation2 + $0x2d8] sm:$0xf]  ;;  %v1843_v31 = vor.u32 %v2395_v21, %v1842_v20  ;;  %v2431_v20 = vld [vmem:[#allocation2 + $0x280] sm:$0xf0] }
  0x5e   :  { %1182 = vmatpush.bf16.msra.mxu1 %v1983_v29  ;;  %v2443_v29 = vld [vmem:[#allocation2 + $0x2e0] sm:$0xf0] }
  0x5f   :  { %1207 = vmatpush.bf16.msrb.mxu2 %v2187_v27  ;;  %v2416_v27 = vld [vmem:[#allocation2 + $0x208] sm:$0xf0]  ;;  %v2035_v39 = vor.u32 %v2443_v29, %v2034_v28  ;;  %v2470_v28 = vld [vmem:[#allocation2 + $0x3b8] sm:$0xf0] }
  0x60   :  { %1195 = vmatpush.bf16.msra.mxu3 %v2079_v34  ;;  %v2392_v34 = vld [vmem:[#allocation2 + $0x148] sm:$0xf0]  ;;  %v1927_v38 = vor.u32 %v2416_v27, %v1926_v26  ;;  %v2353_v26 = vld [vmem:[#allocation2 + $0x10] sm:$0xf0]  ;;  %v2142_v27 = vld [vmem:[#allocation2 + $0x3b0] sm:$0xf] }
  0x61   :  { %1170 = vmatpush.bf16.msra.mxu0 %v1875_v44  ;;  %v1831_v44 = vor.u32 %v2392_v34, %v1830_v33  ;;  %v2401_v33 = vld [vmem:[#allocation2 + $0x190] sm:$0xf0]  ;;  %v1974_v34 = vld [vmem:[#allocation2 + $0x260] sm:$0xf] }
  0x62   :  { %1183 = vmatpush.bf16.msra.mxu1 %v1971_v46  ;;  %v1723_v46 = vor.u32 %v2365_v37, %v1722_v36  ;;  %v2428_v36 = vld [vmem:[#allocation2 + $0x268] sm:$0xf0]  ;;  %v2250_v37 = vld [vmem:[#allocation2 + $0x488] sm:$0xf] }
  0x63   :  { %1208 = vmatpush.bf16.msrb.mxu2 %v2175_v41  ;;  %v2413_v41 = vld [vmem:[#allocation2 + $0x1f0] sm:$0xf0] }
  0x64   :  { %1196 = vmatpush.bf16.msra.mxu3 %v2067_v50  ;;  %v2362_v50 = vld [vmem:[#allocation2 + $0x58] sm:$0xf0]  ;;  %v1915_v51 = vor.u32 %v2413_v41, %v1914_v40  ;;  %v2143_v41 = vor.u32 %v2470_v28, %v2142_v27  ;;  %v2476_v27 = vld [vmem:[#allocation2 + $0x3e8] sm:$0xf0]  ;;  %v2058_v28 = vld [vmem:[#allocation2 + $0x308] sm:$0xf] }
  0x65   :  { %1171 = vmatpush.bf16.msra.mxu0 %v1863_v63  ;;  %v1711_v59 = vor.u32 %v2362_v50, %v1710_v49  ;;  %v1698_v63 = vld [vmem:[#allocation2 + $0x38] sm:$0xf]  ;;  %v2467_v49 = vld [vmem:[#allocation2 + $0x3a0] sm:$0xf0]  ;;  %v1975_v50 = vor.u32 %v2428_v36, %v1974_v34  ;;  %v2154_v34 = vld [vmem:[#allocation2 + $0x3c8] sm:$0xf] }
  0x66   :  { %1184 = vmatpush.bf16.msra.mxu1 %v1959_v0  ;;  %v2359_v0 = vld [vmem:[#allocation2 + $0x40] sm:$0xf0]  ;;  %v2473_v36 = vld [vmem:[#allocation2 + $0x3d0] sm:$0xf0] }
  0x67   :  { %1209 = vmatpush.bf16.msrb.mxu2 %v2163_v58  ;;  %v1819_v58 = vor.u32 %v2389_v48, %v1818_v47  ;;  %v1699_v9 = vor.u32 %v2359_v0, %v1698_v63  ;;  %v2494_v47 = vld [vmem:[#allocation2 + $0x478] sm:$0xf0]  ;;  %v2130_v48 = vld [vmem:[#allocation2 + $0x398] sm:$0xf] }
  0x68   :  { %1197 = vmatpush.bf16.msra.mxu3 %v2055_v3  ;;  %1172 = vmatmul.bf16.vlgmr.msra.gmra.mxu0 %v2633_v53  ;;  %v1890_v3 = vld [vmem:[#allocation2 + $0x1b8] sm:$0xf]  ;;  %v2131_v57 = vor.u32 %v2467_v49, %v2130_v48  ;;  %v2498_v49 = vld [vmem:[%s2781_s3] sm:$0xff] }
  0x69   :  { %1255 = vmatpush.bf16.msrb.mxu0 %v1951_v11  ;;  %1185 = vmatmul.bf16.vlgmr.msra.gmra.mxu1 %v2651_v19  ;;  %v2383_v11 = vld [vmem:[#allocation2 + $0x100] sm:$0xf0] }
  0x6a   :  { %1229 = vmatpush.bf16.msrb.mxu1 %v1759_v4  ;;  %v2407_v4 = vld [vmem:[#allocation2 + $0x1c0] sm:$0xf0]  ;;  %v1795_v21 = vor.u32 %v2383_v11, %v1794_v10  ;;  %v2094_v10 = vld [vmem:[#allocation2 + $0x350] sm:$0xf]  ;;  %v2458_v11 = vld [vmem:[#allocation2 + $0x358] sm:$0xf0] }
  0x6b   :  { %1210 = vmatpush.bf16.msrb.mxu2 %v2151_v12  ;;  %1198 = vmatmul.bf16.vlgmr.msra.gmra.mxu3 %v2667_v30  ;;  %v1686_v12 = vld [vmem:[#allocation2 + $0x20] sm:$0xf]  ;;  %v1891_v14 = vor.u32 %v2407_v4, %v1890_v3  ;;  %v2488_v3 = vld [vmem:[#allocation2 + $0x448] sm:$0xf0]  ;;  %v2106_v4 = vld [vmem:[#allocation2 + $0x368] sm:$0xf] }
  0x6c   :  { %1223 = vmatpush.bf16.msrb.mxu3 %v2247_v7  ;;  %v2434_v7 = vld [vmem:[#allocation2 + $0x298] sm:$0xf0]  ;;  %v1687_v22 = vor.u32 %v2356_v13, %v1686_v12  ;;  %v2095_v12 = vor.u32 %v2458_v11, %v2094_v10  ;;  %v2190_v13 = vld [vmem:[#allocation2 + $0x410] sm:$0xf] }
  0x6d   :  { %1256 = vmatpush.bf16.msrb.mxu0 %v1939_v24  ;;  %v1999_v15 = vor.u32 %v2434_v7, %v1998_v6  ;;  %v2380_v24 = vld [vmem:[#allocation2 + $0xe8] sm:$0xf0]  ;;  %v2461_v6 = vld [vmem:[#allocation2 + $0x370] sm:$0xf0] }
  0x6e   :  { %1230 = vmatpush.bf16.msrb.mxu1 %v1747_v18  ;;  %1211 = vmatmul.bf16.vlgmr.msrb.gmra.mxu2 %v2669_v35  ;;  %v1986_v18 = vld [vmem:[#allocation2 + $0x278] sm:$0xf] }
  0x6f   :  { %1268 = vmatpush.bf16.msra.mxu2 %v2047_v25  ;;  %v1674_v25 = vld [vmem:[#allocation2 + $0x8] sm:$0xf] }
  0x70   :  { %1242 = vmatpush.bf16.msra.mxu3 %v1855_v17  ;;  %v2404_v17 = vld [vmem:[#allocation2 + $0x1a8] sm:$0xf0]  ;;  %v1675_v40 = vor.u32 %v2353_v26, %v1674_v25  ;;  %v2166_v26 = vld [vmem:[#allocation2 + $0x3e0] sm:$0xf] }
  0x71   :  { %1257 = vmatpush.bf16.msrb.mxu0 %v1927_v38  ;;  %v1879_v29 = vor.u32 %v2404_v17, %v1878_v16  ;;  %v2497_v38 = vld [vmem:[#allocation2 + $0x490] sm:$0xf0]  ;;  %v2455_v16 = vld [vmem:[#allocation2 + $0x340] sm:$0xf0] }
  0x72   :  { %1231 = vmatpush.bf16.msrb.mxu1 %v1735_v32  ;;  %v1866_v32 = vld [vmem:[#allocation2 + $0x188] sm:$0xf] }
  0x73   :  { %1269 = vmatpush.bf16.msra.mxu2 %v2035_v39  ;;  %v1783_v39 = vor.u32 %v2380_v24, %v1782_v23  ;;  %v2504_v23 = vld [vmem:[%s2781_s3 + $0x30] sm:$0xff] }
  0x74   :  { %1243 = vmatpush.bf16.msra.mxu3 %v1843_v31  ;;  %v1987_v31 = vor.u32 %v2431_v20, %v1986_v18  ;;  %v2178_v20 = vld [vmem:[#allocation2 + $0x3f8] sm:$0xf] }
  0x75   :  { %1258 = vmatpush.bf16.msrb.mxu0 %v1915_v51  ;;  %v2251_v51 = vor.u32 %v2497_v38, %v2250_v37  ;;  %v2502_v37 = vld [vmem:[%s2781_s3 + $0x20] sm:$0xff] }
  0x76   :  { %1232 = vmatpush.bf16.msrb.mxu1 %v1723_v46  ;;  %v1867_v46 = vor.u32 %v2401_v33, %v1866_v32  ;;  %v2167_v32 = vor.u32 %v2476_v27, %v2166_v26  ;;  %v2521_v27 = vld [vmem:[%s2781_s3 + $0xb8] sm:$0xff] }
  0x77   :  { %1270 = vmatpush.bf16.msra.mxu2 %v2023_v52  ;;  %v1962_v52 = vld [vmem:[#allocation2 + $0x248] sm:$0xf] }
  0x78   :  { %1244 = vmatpush.bf16.msra.mxu3 %v1831_v44  ;;  %v2238_v44 = vld [vmem:[#allocation2 + $0x470] sm:$0xf]  ;;  %v1963_v63 = vor.u32 %v2425_v54, %v1962_v52 }
  0x79   :  { %1259 = vmatpush.bf16.msrb.mxu0 %v1903_v1  ;;  %v2239_v56 = vor.u32 %v2494_v47, %v2238_v44  ;;  %v2119_v1 = vor.u32 %v2464_v62, %v2118_v61  ;;  %v2499_v44 = vld [vmem:[%s2781_s3 + $0x8] sm:$0xff] }
  0x7a   :  { %1233 = vmatpush.bf16.msrb.mxu1 %v1711_v59  ;;  %v2491_v59 = vld [vmem:[#allocation2 + $0x460] sm:$0xf0] }
  0x7b   :  { %1271 = vmatpush.bf16.msra.mxu2 %v2011_v2  ;;  %2253 = vmatmul.msk.bf16.vlgmr.msrb.gmra.mxu3 %vm1043_vm0, %v2657_v45  ;;  %v2214_v2 = vld [vmem:[#allocation2 + $0x440] sm:$0xf] }
  0x7c   :  { %1245 = vmatpush.bf16.msra.mxu3 %v1819_v58  ;;  %v2226_v58 = vld [vmem:[#allocation2 + $0x458] sm:$0xf]  ;;  %v2215_v7 = vor.u32 %v2488_v3, %v2214_v2 }
  0x7d   :  { %1260 = vmatpush.bf16.msrb.mxu0 %v1891_v14  ;;  %v2227_v0 = vor.u32 %v2491_v59, %v2226_v58  ;;  %v2482_v14 = vld [vmem:[#allocation2 + $0x418] sm:$0xf0] }
  0x7e   :  { %1234 = vmatpush.bf16.msrb.mxu1 %v1699_v9  ;;  %v2202_v9 = vld [vmem:[#allocation2 + $0x428] sm:$0xf]  ;;  %v2191_v17 = vor.u32 %v2482_v14, %v2190_v13  ;;  %v2509_v13 = vld [vmem:[%s2781_s3 + $0x58] sm:$0xff]  ;;  %v2508_v14 = vld [vmem:[%s2781_s3 + $0x50] sm:$0xff] }
  0x7f   :  { %1272 = vmatpush.bf16.msra.mxu2 %v1999_v15  ;;  %v2082_v15 = vld [vmem:[#allocation2 + $0x338] sm:$0xf] }
  0x80   :  { %1246 = vmatpush.bf16.msra.mxu3 %v1807_v8  ;;  %v2107_v8 = vor.u32 %v2461_v6, %v2106_v4  ;;  %v2083_v18 = vor.u32 %v2455_v16, %v2082_v15  ;;  %v2512_v4 = vld [vmem:[%s2781_s3 + $0x70] sm:$0xff]  ;;  %v2507_v15 = vld [vmem:[%s2781_s3 + $0x48] sm:$0xff] }
  0x81   :  { %1261 = vmatpush.bf16.msrb.mxu0 %v1879_v29  ;;  %v2449_v29 = vld [vmem:[#allocation2 + $0x310] sm:$0xf0] }
  0x82   :  { %1235 = vmatpush.bf16.msrb.mxu1 %v1687_v22  ;;  %v2070_v22 = vld [vmem:[#allocation2 + $0x320] sm:$0xf]  ;;  %v2059_v33 = vor.u32 %v2449_v29, %v2058_v28 }
  0x83   :  { %1273 = vmatpush.bf16.msra.mxu2 %v1987_v31  ;;  %v2503_v31 = vld [vmem:[%s2781_s3 + $0x28] sm:$0xff] }
  0x84   :  { %1247 = vmatpush.bf16.msra.mxu3 %v1795_v21  ;;  %v2479_v21 = vld [vmem:[#allocation2 + $0x400] sm:$0xf0] }
  0x85   :  { %1262 = vmatpush.bf16.msrb.mxu0 %v1867_v46  ;;  %v2179_v24 = vor.u32 %v2479_v21, %v2178_v20 }
  0x86   :  { %1236 = vmatpush.bf16.msrb.mxu1 %v1675_v40 }
  0x87   :  { %1274 = vmatpush.bf16.msra.mxu2 %v1975_v50 }
  0x88   :  { %1248 = vmatpush.bf16.msra.mxu3 %v1783_v39  ;;  %1263 = vmatmul.bf16.vlgmr.msrb.gmra.mxu0 %v2633_v53  ;;  %v2501_v39 = vld [vmem:[%s2781_s3 + $0x18] sm:$0xff] }
  0x89   :  { %1314 = vmatpush.bf16.msra.mxu0 %v2251_v51  ;;  %1237 = vmatmul.bf16.vlgmr.msrb.gmra.mxu1 %v2638_v60  ;;  %v2485_v60 = vld [vmem:[#allocation2 + $0x430] sm:$0xf0] }
  0x8a   :  { %1281 = vmatpush.bf16.msra.mxu1 %v2143_v41  ;;  %v2203_v53 = vor.u32 %v2485_v60, %v2202_v9  ;;  %v2500_v41 = vld [vmem:[%s2781_s3 + $0x10] sm:$0xff]  ;;  %v2511_v9 = vld [vmem:[%s2781_s3 + $0x68] sm:$0xff]  ;;  %v2510_v60 = vld [vmem:[%s2781_s3 + $0x60] sm:$0xff] }
  0x8b   :  { %1275 = vmatpush.bf16.msra.mxu2 %v1963_v63  ;;  %v2513_v63 = vld [vmem:[%s2781_s3 + $0x78] sm:$0xff] }
  0x8c   :  { %1249 = vmatpush.bf16.msra.mxu3 %v1771_v55 }
  0x8d   :  { %1541 = vmatpush.bf16.msrb.mxu0 %v2513_v63 }
  0x8e   :  { %1282 = vmatpush.bf16.msra.mxu1 %v2131_v57  ;;  %1276 = vmatmul.bf16.vlgmr.msra.gmra.mxu2 %v2651_v19  ;;  %v2452_v19 = vld [vmem:[#allocation2 + $0x328] sm:$0xf0] }
  0x8f   :  { %1250 = vmatmul.bf16.vlgmr.msra.gmra.mxu3 %v2645_v5  ;;  %v2505_v5 = vld [vmem:[%s2781_s3 + $0x38] sm:$0xff]  ;;  %v2071_v25 = vor.u32 %v2452_v19, %v2070_v22 }
  0x90   :  { %1294 = vmatpush.bf16.msrb.mxu3 %v2239_v56  ;;  %1528 = vmatpush.bf16.msrb.mxu2 %v2505_v5 }
  0x91   :  { %1542 = vmatpush.bf16.msrb.mxu0 %v2512_v4 }
  0x92   :  { %1283 = vmatpush.bf16.msra.mxu1 %v2119_v1 }
  0x94   :  { %1295 = vmatpush.bf16.msrb.mxu3 %v2227_v0  ;;  %1529 = vmatpush.bf16.msrb.mxu2 %v2504_v23 }
  0x95   :  { %1543 = vmatpush.bf16.msrb.mxu0 %v2511_v9 }
  0x96   :  { %1284 = vmatpush.bf16.msra.mxu1 %v2107_v8 }
  0x98   :  { %1296 = vmatpush.bf16.msrb.mxu3 %v2215_v7  ;;  %2254 = vmatmul.msk.bf16.vlgmr.msra.gmra.mxu0 %vm1043_vm0, %v2657_v45  ;;  %v2155_v45 = vor.u32 %v2473_v36, %v2154_v34  ;;  %v2520_v36 = vld [vmem:[%s2781_s3 + $0xb0] sm:$0xff] }
  0x99   :  { %1530 = vmatpush.bf16.msrb.mxu2 %v2503_v31  ;;  %1544 = vmatpush.bf16.msrb.mxu0 %v2510_v60 }
  0x9a   :  { %1285 = vmatpush.bf16.msra.mxu1 %v2095_v12 }
  0x9c   :  { %1297 = vmatpush.bf16.msrb.mxu3 %v2203_v53 }
  0x9d   :  { %1531 = vmatpush.bf16.msrb.mxu2 %v2502_v37  ;;  %1545 = vmatpush.bf16.msrb.mxu0 %v2509_v13  ;;  %v2519_v37 = vld [vmem:[%s2781_s3 + $0xa8] sm:$0xff]  ;;  %v2527_v13 = vld [vmem:[%s2782_s4] ss:$0 sm:$0xff]  ;;  %s2591_s4 = smov [#allocation5]  }
  0x9e   :  { %1286 = vmatpush.bf16.msra.mxu1 %v2083_v18  ;;  %v2506_v18 = vld [vmem:[%s2781_s3 + $0x40] sm:$0xff]  ;;  %s1652_s16 = sshll.u32 %s2591_s4, 4  ;;  %s1653_s16 = int_to_ptr.vmem [resolvable:$true] %s1652_s16 }
  0xa0   :  { %1298 = vmatpush.bf16.msrb.mxu3 %v2191_v17 }
  0xa1   :  { %1532 = vmatpush.bf16.msrb.mxu2 %v2501_v39  ;;  %1546 = vmatpush.bf16.msrb.mxu0 %v2508_v14 }
  0xa2   :  { %1287 = vmatpush.bf16.msra.mxu1 %v2071_v25 }
  0xa4   :  { %1299 = vmatpush.bf16.msrb.mxu3 %v2179_v24 }
  0xa5   :  { %v1056_v38 = vpop.f32.mrf.mxu0  ;;  %1533 = vmatpush.bf16.msrb.mxu2 %v2500_v41  ;;  %1547 = vmatpush.bf16.msrb.mxu0 %v2507_v15 }
  0xa6   :  { %1288 = vmatpush.bf16.msra.mxu1 %v2059_v33  ;;  %v1069_v40 = vpop.f32.mrf.mxu1 }
  0xa8   :  { %1300 = vmatpush.bf16.msrb.mxu3 %v2167_v32 }
  0xa9   :  { %1289 = vmatmul.bf16.vlgmr.msra.gmra.mxu1 %v2667_v30  ;;  %v2710_v30 = vld [vmem:[%s2780_s2] sm:$0x7]  ;;  %1534 = vmatpush.bf16.msrb.mxu2 %v2499_v44 }
  0xaa   :  { %v253_v43 = vperm.slane %v2710_v30, 0  ;;  %v254_v17 = vperm.slane %v2710_v30, 1  ;;  %1548 = vmatpush.bf16.msrb.mxu0 %v2506_v18  ;;  %1554 = vmatpush.bf16.msrb.mxu1 %v2521_v27  ;;  %v1599_v18 = vld [vmem:[%s2783_s5] sm:$0xff] }
  0xac   :  { %1301 = vmatpush.bf16.msrb.mxu3 %v2155_v45  ;;  %v1057_v47 = vadd.f32 %v1056_v38, %v253_v43 }
  0xad   :  { %v1058_v42 = vpop.f32.mrf.mxu0  ;;  %1535 = vmatpush.bf16.msrb.mxu2 %v2498_v49  ;;  %v2516_v49 = vld [vmem:[%s2781_s3 + $0x90] sm:$0xff] }
  0xae   :  { %v1071_v46 = vpop.f32.mrf.mxu1  ;;  %v1095_v48 = vpop.f32.mrf.mxu3  ;;  %v1070_v51 = vadd.f32 %v1069_v40, %v1057_v47  ;;  %1555 = vmatpush.bf16.msrb.mxu1 %v2520_v36 }
  0xaf   :  { %1302 = vmatmul.bf16.vlgmr.msrb.gmra.mxu3 %v2669_v35  ;;  %v1082_v35 = vpop.f32.mrf.mxu2  ;;  %v2517_v46 = vld [vmem:[%s2781_s3 + $0x98] sm:$0xff] }
  0xb0   :  { %v1083_v52 = vadd.f32 %v1082_v35, %v1070_v51  ;;  %v2518_v35 = vld [vmem:[%s2781_s3 + $0xa0] sm:$0xff]  ;;  %v2515_v51 = vld [vmem:[%s2781_s3 + $0x88] sm:$0xff] }
  0xb2   :  { %v1096_v56 = vadd.f32 %v1095_v48, %v1083_v52  ;;  %1556 = vmatpush.bf16.msrb.mxu1 %v2519_v37 }
  0xb6   :  { %v1097_v54 = vpop.f32.mrf.mxu3  ;;  %1557 = vmatpush.bf16.msrb.mxu1 %v2518_v35 }
  0xb7   :  { %v1084_v50 = vpop.f32.mrf.mxu2  ;;  %v255_v54 = vperm.slane %v2710_v30, 2 }
  0xba   :  { %1558 = vmatpush.bf16.msrb.mxu1 %v2517_v46 }
  0xbe   :  { %1559 = vmatpush.bf16.msrb.mxu1 %v2516_v49 }
  0xbf   :  { %v1134_v55 = vpop.f32.mrf.mxu2 }
  0xc2   :  { %1560 = vmatpush.bf16.msrb.mxu1 %v2515_v51 }
  0xc5   :  { %v1108_v57 = vpop.f32.mrf.mxu0 }
  0xc6   :  { %v1109_v58 = vadd.f32 %v1108_v57, %v1096_v56  ;;  %v1121_v59 = vpop.f32.mrf.mxu1  ;;  %v2514_v56 = vld [vmem:[%s2781_s3 + $0x80] sm:$0xff] }
  0xc7   :  { %v1136_v61 = vpop.f32.mrf.mxu2  ;;  %1561 = vmatpush.bf16.msrb.mxu1 %v2514_v56 }
  0xc8   :  { %v1122_v62 = vadd.f32 %v1121_v59, %v1109_v58 }
  0xca   :  { %v1135_v0 = vadd.f32 %v1134_v55, %v1122_v62 }
  0xcc   :  { %v1320_v1 = vpack.c.bf16 %v1135_v0, %v1135_v0 }
  0xcd   :  { %v1110_v3 = vpop.f32.mrf.mxu0 }
  0xce   :  { %v1147_v2 = vpop.f32.mrf.mxu3  ;;  %v1323_v6 = vunpack.c.l.bf16 %v1320_v1  ;;  %v1123_v7 = vpop.f32.mrf.mxu1 }
  0xcf   :  { %v1148_v20 = vadd.f32 %v1147_v2, %v254_v17 }
  0xd0   :  { %2528 = vtanh.f32 %v1323_v6 }
  0xd1   :  { %v1160_v8 = vpop.f32.mrf.mxu2 }
  0xd2   :  { %v1161_v24 = vadd.f32 %v1160_v8, %v1148_v20 }
  0xd6   :  { %v1149_v10 = vpop.f32.mrf.mxu3  ;;  %v2529_v11 = vpop.eup %2528 }
  0xd7   :  { %v1329_v53 = vpack.c.bf16 %v2529_v11, %v2529_v11 }
  0xd9   :  { %v1162_v12 = vpop.f32.mrf.mxu2  ;;  %1536 = vmatmul.bf16.vlgmr.msrb.gmra.mxu2 %v1329_v53 }
  0xe5   :  { %v1173_v16 = vpop.f32.mrf.mxu0 }
  0xe6   :  { %v1186_v5 = vpop.f32.mrf.mxu1  ;;  %v1174_v25 = vadd.f32 %v1173_v16, %v1161_v24 }
  0xe8   :  { %v1187_v28 = vadd.f32 %v1186_v5, %v1174_v25 }
  0xed   :  { %v1175_v22 = vpop.f32.mrf.mxu0 }
  0xee   :  { %v1199_v21 = vpop.f32.mrf.mxu3  ;;  %v1188_v23 = vpop.f32.mrf.mxu1 }
  0xef   :  { %v1200_v31 = vadd.f32 %v1199_v21, %v1187_v28 }
  0xf1   :  { %v1212_v19 = vpop.f32.mrf.mxu2 }
  0xf2   :  { %v1213_v32 = vadd.f32 %v1212_v19, %v1200_v31 }
  0xf6   :  { %v1201_v26 = vpop.f32.mrf.mxu3 }
  0xf9   :  { %v1214_v29 = vpop.f32.mrf.mxu2 }
  0xfe   :  { %v1225_v33 = vpop.f32.mrf.mxu3 }
  0xff   :  { %v1226_v34 = vadd.f32 %v1225_v33, %v1213_v32 }
 0x101   :  { %v1321_v45 = vpack.c.bf16 %v1226_v34, %v1226_v34 }
 0x103   :  { %v1324_v38 = vunpack.c.l.bf16 %v1321_v45 }
 0x105   :  { %2530 = vtanh.f32 %v1324_v38  ;;  %v1264_v40 = vpop.f32.mrf.mxu0 }
 0x106   :  { %v1238_v39 = vpop.f32.mrf.mxu1  ;;  %v1227_v41 = vpop.f32.mrf.mxu3 }
 0x107   :  { %v1239_v58 = vadd.f32 %v1238_v39, %v255_v54 }
 0x10b   :  { %v2531_v42 = vpop.eup %2530 }
 0x10c   :  { %v1330_v43 = vpack.c.bf16 %v2531_v42, %v2531_v42 }
 0x10d   :  { %v1266_v47 = vpop.f32.mrf.mxu0 }
 0x10e   :  { %v1240_v44 = vpop.f32.mrf.mxu1  ;;  %1549 = vmatmul.bf16.vlgmr.msrb.gmra.mxu0 %v1330_v43 }
 0x111   :  { %v1277_v50 = vpop.f32.mrf.mxu2 }
 0x112   :  { %v1251_v48 = vpop.f32.mrf.mxu3 }
 0x113   :  { %v1252_v61 = vadd.f32 %v1251_v48, %v1239_v58 }
 0x115   :  { %v1316_v52 = vpop.f32.mrf.mxu0  ;;  %v1265_v63 = vadd.f32 %v1264_v40, %v1252_v61 }
 0x117   :  { %v1278_v0 = vadd.f32 %v1277_v50, %v1265_v63 }
 0x119   :  { %v1279_v57 = vpop.f32.mrf.mxu2 }
 0x11a   :  { %v1253_v55 = vpop.f32.mrf.mxu3 }
 0x11d   :  { %v1318_v59 = vpop.f32.mrf.mxu0 }
 0x126   :  { %v1290_v62 = vpop.f32.mrf.mxu1 }
 0x127   :  { %v1291_v2 = vadd.f32 %v1290_v62, %v1278_v0 }
 0x12e   :  { %v1292_v1 = vpop.f32.mrf.mxu1 }
 0x132   :  { %v1303_v3 = vpop.f32.mrf.mxu3 }
 0x133   :  { %v1304_v4 = vadd.f32 %v1303_v3, %v1291_v2 }
 0x135   :  { %v1317_v6 = vadd.f32 %v1316_v52, %v1304_v4 }
 0x137   :  { %v1322_v30 = vpack.c.bf16 %v1317_v6, %v1317_v6 }
 0x139   :  { %v1325_v7 = vunpack.c.l.bf16 %v1322_v30 }
 0x13a   :  { %v1305_v8 = vpop.f32.mrf.mxu3 }
 0x13b   :  { %2532 = vtanh.f32 %v1325_v7 }
 0x141   :  { %v2533_v9 = vpop.eup %2532 }
 0x142   :  { %v1331_v60 = vpack.c.bf16 %v2533_v9, %v2533_v9 }
 0x144   :  { %1562 = vmatmul.bf16.vlgmr.msrb.gmra.mxu1 %v1331_v60 }
 0x15c   :  { %v1537_v10 = vpop.f32.mrf.mxu2 }
 0x15d   :  { %v1538_v14 = vadd.f32 %v2527_v13, %v1537_v10 }
 0x164   :  { %v1539_v11 = vpop.f32.mrf.mxu2 }
 0x18b   :  { %v1550_v53 = vpop.f32.mrf.mxu0 }
 0x18c   :  { %v1551_v15 = vadd.f32 %v1550_v53, %v1538_v14 }
 0x193   :  { %v1552_v12 = vpop.f32.mrf.mxu0 }
 0x1c1   :  { %v1563_v16 = vpop.f32.mrf.mxu1 }
 0x1c2   :  { %v1564_v5 = vadd.f32 %v1563_v16, %v1551_v15 }
 0x1c4   :  { %1567 = vxpose.xlu0.b32.start.end [1/1] (short) (narrow) %v1564_v5, 8 }
 0x1c9   :  { %v1565_v17 = vpop.f32.mrf.mxu1 }
 0x1cc   :  { %1600 = vxpose.xlu0.b32.start.end [1/1] (short) (narrow) %v1599_v18, 8 }
 0x268   :  { %v1583_v20 = vpop.trf.xlu0 }
 0x269   :  { %v1632_v21 = vmul.f32 0.5, %v1583_v20  ;;  %1644 = vst.msk [vmem:[#allocation5] sm:$0xf] %vm1643_vm1, %v1583_v20 }
 0x26b   :  { %v1633_v22 = vmul.f32 1.442695, %v1632_v21 }
 0x26d   :  { %2534 = vpow2.f32 %v1633_v22 }
 0x270   :  { %v1616_v19 = vpop.trf.xlu0 }
 0x271   :  { %v1636_v23 = vrot.slane %v1616_v19, 6 }
 0x273   :  { %v2535_v24 = vpop.eup %2534 }
 0x274   :  { %v1638_v25 = vmul.f32 %v2535_v24, %v1636_v23 }
 0x276   :  { %v1640_v26 = vrot.slane %v1638_v25, 2 }
 0x278   :  { %v1642_v27 = vadd.f32 %v1640_v26, %v1583_v20 }
 0x27a   :  { %1646 = vst.msk [vmem:[#allocation5 + $0x4] sm:$0x3] %vm1645_vm2, %v1642_v27 }
 0x27b   :  { %1657 = dma.vmem_to_hbm [thread:$0]  %s1653_s16, 128, %s1655_s18, [#allocation4]  }
 0x27c   :  { %2586 = dma.done.wait [#allocation4], 128  }
 0x27d   :  { %2587 = vsyncadd [#allocation4], 4294967168 }
 0x27e   :  { %1662 = vsyncpa [#allocation3], 1 }
 0x27f   :  { %1663 = vsyncpa [#allocation4], 1 }

</bundles_post_ra>
